<compile_context>
chip_gen: v7x
topology: tpu7x:2x2x1
jax: 0.10.0
libtpu: 0.0.40
codegen_flags: <defaults>
</compile_context>

<pallas_src>
import functools

import jax
import jax.numpy as jnp
from jax.experimental import pallas as pl
from jax.experimental.pallas import tpu as pltpu


_ATTR_OFFSET = 10  # targets[:, 10:] in the reference PyTorch module


# ---------------------------------------------------------------------------
# Fused kernel (per batch tile): 3x softmax-CE partials + BCE-with-logits partial
# ---------------------------------------------------------------------------
def _fused_loss_kernel(l1_ref, l2_ref, l3_ref, l4_ref, tgt_ref, idx_ref, out_ref,
                       *, n_total, tile_n, attr_dim):
    # l1/l2/l3: (tile_n, C) native dtype; l4: (tile_n, K); tgt: (tile_n, 10+K)
    # idx: (tile_n, 3) int32; out: (1, 8, 128) f32 -- lanes 0..3 of sublane 0..7
    # carry the four per-tile partial sums (bce, ce1, ce2, ce3).
    pid = pl.program_id(0)

    # Row-validity mask for the (possibly ragged) last tile: padded rows must not
    # contribute to any sum, and the mean divides by the GLOBAL batch size.
    row = pid * tile_n + jax.lax.broadcasted_iota(jnp.int32, (tile_n, 1), 0)
    valid_b = row < n_total                       # (tile_n, 1) bool
    valid_f = valid_b.astype(jnp.float32)         # (tile_n, 1) f32
    inv_n = 1.0 / n_total

    # JAX does not CSE broadcast_in_dim -> build each iota once and reuse it.
    iota_cache = {}

    def lane_iota(shape):
        if shape not in iota_cache:
            iota_cache[shape] = jax.lax.broadcasted_iota(jnp.int32, shape, 1)
        return iota_cache[shape]

    idx_all = idx_ref[...]                        # (tile_n, 3) int32, all 3 heads
    lane3 = lane_iota(idx_all.shape)

    def ce_partial(logits_ref, head):
        # Native-dtype load (bf16 in training), cast to f32 in-register; padded
        # rows are replaced by 0 before any reduction so garbage/NaN bits in the
        # OOB region of the last tile cannot poison the sums.
        x = jnp.where(valid_b, logits_ref[...].astype(jnp.float32), 0.0)  # (tile_n, c)
        c = x.shape[-1]
        m = jnp.max(x, axis=-1, keepdims=True)
        lse = m + jnp.log(jnp.sum(jnp.exp(x - m), axis=-1, keepdims=True))
        # Extract this head's class index from the packed (tile_n, 3) input.
        idx_h = jnp.sum(jnp.where(lane3 == head, idx_all, 0), axis=-1, keepdims=True)
        onehot = (lane_iota((tile_n, c)) == idx_h).astype(jnp.float32)
        picked = jnp.sum(x * onehot, axis=-1, keepdims=True)
        # NOTE: out-of-range / ignore (-100) labels contribute loss = lse
        # (picked = 0) instead of raising like torch nll_loss.
        return jnp.sum((lse - picked) * valid_f) * inv_n

    ce1 = ce_partial(l1_ref, 0)
    ce2 = ce_partial(l2_ref, 1)
    ce3 = ce_partial(l3_ref, 2)

    # -- BCE-with-logits head: logit4 vs targets[:, 10:] ----------------------
    # Column selection is a static in-kernel lane slice; Mosaic lowers the lane
    # offset to an XLU lane-rotate/relayout (no MXU selection matmul).
    x4 = jnp.where(valid_b, l4_ref[...].astype(jnp.float32), 0.0)            # (tile_n, k)
    t_full = tgt_ref[...].astype(jnp.float32)                                # (tile_n, 10+k)
    t_attr = jnp.where(valid_b, t_full[:, _ATTR_OFFSET:_ATTR_OFFSET + attr_dim], 0.0)
    # numerically stable BCE: max(x,0) - x*t + log1p(exp(-|x|))
    per_elem = (jnp.maximum(x4, 0.0) - x4 * t_attr
                + jnp.log1p(jnp.exp(-jnp.abs(x4))))
    bce = jnp.sum(per_elem * valid_f) * inv_n     # sum over attrs, mean over batch

    # Lane-dense (8,128) partial-sum slab -> unmasked vst. Lanes 0..3 carry the
    # four losses (broadcast down the sublanes), everything else is zero.
    lane = lane_iota((8, 128))
    slab = (jnp.where(lane == 0, bce, 0.0) + jnp.where(lane == 1, ce1, 0.0)
            + jnp.where(lane == 2, ce2, 0.0) + jnp.where(lane == 3, ce3, 0.0))
    out_ref[0] = slab


# ---------------------------------------------------------------------------
# PartBCELoss forward (sample_weight=None, size_sum=True, smoothing=None)
# ---------------------------------------------------------------------------
def part_bce_loss(logits_part_fpn, targets, targets_softmax, *, tile_n=None):
    logit1, logit2, logit3, logit4 = logits_part_fpn
    n = logit1.shape[0]
    c1, c2, c3 = logit1.shape[1], logit2.shape[1], logit3.shape[1]
    k = logit4.shape[1]
    t_cols = targets.shape[1]

    # Batch tile size. Per-step VMEM stays tiny even on v7x's 32 MiB scoped
    # budget: 512 * (c1+c2+c3+k+t_cols+3) * 4 B * 2 buffers << 1 MiB for typical
    # attribute-head widths, so double-buffering depth 2 is always intact.
    if tile_n is None:
        tile_n = 512
    if tile_n >= n:
        tile_n = n                                 # block == full dim is always legal
    else:
        tile_n = min(((tile_n + 31) // 32) * 32, n)  # packing-friendly sublane block
    num_tiles = pl.cdiv(n, tile_n)

    # Single packed (N, 3) int32 class-index input (one DMA instead of three).
    idx = jnp.stack(
        [jnp.asarray(t).reshape(n).astype(jnp.int32) for t in targets_softmax[:3]],
        axis=1)

    kernel = functools.partial(
        _fused_loss_kernel, n_total=n, tile_n=tile_n, attr_dim=k)

    # Advisory cost so XLA overlaps this small kernel with surrounding work.
    bpe_l = jnp.dtype(logit1.dtype).itemsize
    bpe_t = jnp.dtype(targets.dtype).itemsize
    cost = pl.CostEstimate(
        flops=int(8 * n * (c1 + c2 + c3 + k)),
        transcendentals=int(n * (c1 + c2 + c3) + 3 * n + 2 * n * k),
        bytes_accessed=int(bpe_l * n * (c1 + c2 + c3 + k) + bpe_t * n * t_cols
                           + 4 * n * 3 + 4 * num_tiles * 8 * 128),
    )

    out = pl.pallas_call(
        kernel,
        grid=(num_tiles,),
        in_specs=[
            pl.BlockSpec((tile_n, c1), lambda i: (i, 0)),
            pl.BlockSpec((tile_n, c2), lambda i: (i, 0)),
            pl.BlockSpec((tile_n, c3), lambda i: (i, 0)),
            pl.BlockSpec((tile_n, k), lambda i: (i, 0)),
            pl.BlockSpec((tile_n, t_cols), lambda i: (i, 0)),
            pl.BlockSpec((tile_n, 3), lambda i: (i, 0)),
        ],
        out_specs=pl.BlockSpec((1, 8, 128), lambda i: (i, 0, 0)),
        out_shape=jax.ShapeDtypeStruct((num_tiles, 8, 128), jnp.float32),
        compiler_params=pltpu.CompilerParams(
            dimension_semantics=("parallel",)),   # v7x: tiles shard across both TCs
        cost_estimate=cost,
    )(logit1, logit2, logit3, logit4, targets, idx)

    # Tiny wrapper-side reduction over per-tile partial sums (keeps the grid
    # axis "parallel" instead of a serialized in-kernel accumulator).
    sums = jnp.sum(out[:, 0, :4], axis=0)
    loss_m, loss_1, loss_2, loss_3 = sums[0], sums[1], sums[2], sums[3]
    # smoothing is None in __init__, so no label-smoothing branch; size_sum=True.
    return ([loss_m, loss_1, loss_2, loss_3], None)


# ---------------------------------------------------------------------------
# Pure-JAX reference (for verification only)
# ---------------------------------------------------------------------------
def _ref_ce(logits, idx):
    logits = logits.astype(jnp.float32)
    lse = jax.nn.logsumexp(logits, axis=-1)
    picked = jnp.take_along_axis(
        logits, idx[:, None].astype(jnp.int32), axis=-1)[:, 0]
    return jnp.mean(lse - picked)


def _ref_bce(logits, t):
    x = logits.astype(jnp.float32)
    t = t.astype(jnp.float32)
    l = jnp.maximum(x, 0.0) - x * t + jnp.log1p(jnp.exp(-jnp.abs(x)))
    return jnp.mean(jnp.sum(l, axis=1))


if __name__ == "__main__":
    key = jax.random.PRNGKey(0)
    k1, k2, k3, k4, k5, k6, k7, k8 = jax.random.split(key, 8)

    N = 40         # batch (exercises 2 grid tiles incl. a ragged, masked last tile)
    C = 16         # classes for the 3 part heads
    K = 22         # attributes predicted by logit4
    T = 10 + K     # targets width (targets[:, 10:] -> K columns)

    # Native bf16 inputs -- no wrapper-side f32 upcast; the kernel casts in-register.
    logit1 = jax.random.normal(k1, (N, C), dtype=jnp.float32).astype(jnp.bfloat16)
    logit2 = jax.random.normal(k2, (N, C), dtype=jnp.float32).astype(jnp.bfloat16)
    logit3 = jax.random.normal(k3, (N, C), dtype=jnp.float32).astype(jnp.bfloat16)
    logit4 = jax.random.normal(k4, (N, K), dtype=jnp.float32).astype(jnp.bfloat16)

    targets = jax.random.bernoulli(k5, 0.5, (N, T)).astype(jnp.bfloat16)
    ts0 = jax.random.randint(k6, (N,), 0, C, dtype=jnp.int32)
    ts1 = jax.random.randint(k7, (N,), 0, C, dtype=jnp.int32)
    ts2 = jax.random.randint(k8, (N,), 0, C, dtype=jnp.int32)

    (losses, _) = part_bce_loss(
        (logit1, logit2, logit3, logit4), targets, [ts0, ts1, ts2], tile_n=32)
    losses = [jax.block_until_ready(l) for l in losses]
    loss_m, loss_1, loss_2, loss_3 = losses

    # verify against pure-JAX reference (same bf16 values, f32 math)
    ref_m = _ref_bce(logit4, targets[:, 10:])
    ref_1 = _ref_ce(logit1, ts0)
    ref_2 = _ref_ce(logit2, ts1)
    ref_3 = _ref_ce(logit3, ts2)

    assert jnp.allclose(loss_m, ref_m, rtol=1e-4, atol=1e-4), (loss_m, ref_m)
    assert jnp.allclose(loss_1, ref_1, rtol=1e-4, atol=1e-4), (loss_1, ref_1)
    assert jnp.allclose(loss_2, ref_2, rtol=1e-4, atol=1e-4), (loss_2, ref_2)
    assert jnp.allclose(loss_3, ref_3, rtol=1e-4, atol=1e-4), (loss_3, ref_3)

    print("KERNEL_OK")
</pallas_src>

<mosaic_0001>
module attributes {stable_mosaic.version = 11 : i64} {
  func.func @_fused_loss_kernel(%arg0: i32, %arg1: memref<32x16xbf16, #tpu.memory_space<vmem>>, %arg2: memref<32x16xbf16, #tpu.memory_space<vmem>>, %arg3: memref<32x16xbf16, #tpu.memory_space<vmem>>, %arg4: memref<32x22xbf16, #tpu.memory_space<vmem>>, %arg5: memref<32x32xbf16, #tpu.memory_space<vmem>>, %arg6: memref<32x3xi32, #tpu.memory_space<vmem>>, %arg7: memref<1x8x128xf32, #tpu.memory_space<vmem>>) attributes {dimension_semantics = [#tpu.dimension_semantics<parallel>], iteration_bounds = array<i64: 2>, scalar_prefetch = 0 : i64, scratch_operands = 0 : i64, tpu.core_type = #tpu.core_type<tc>, window_params = [{transform_indices = @transform_0, window_bounds = array<i64: 32, 16>}, {transform_indices = @transform_1, window_bounds = array<i64: 32, 16>}, {transform_indices = @transform_2, window_bounds = array<i64: 32, 16>}, {transform_indices = @transform_3, window_bounds = array<i64: 32, 22>}, {transform_indices = @transform_4, window_bounds = array<i64: 32, 32>}, {transform_indices = @transform_5, window_bounds = array<i64: 32, 3>}, {transform_indices = @transform_6, window_bounds = array<i64: 1, 8, 128>}]} {
    %c32_i32 = arith.constant 32 : i32
    %0 = arith.muli %arg0, %c32_i32 : i32
    %1 = tpu.iota {dimensions = array<i32: 0>} : vector<32x1xi32>
    %2 = vector.broadcast %0 : i32 to vector<32x1xi32>
    %3 = arith.addi %2, %1 : vector<32x1xi32>
    %c40_i32 = arith.constant 40 : i32
    %4 = vector.broadcast %c40_i32 : i32 to vector<32x1xi32>
    %5 = arith.cmpi slt, %3, %4 : vector<32x1xi32>
    %6 = arith.extui %5 : vector<32x1xi1> to vector<32x1xi32>
    %7 = arith.sitofp %6 : vector<32x1xi32> to vector<32x1xf32>
    %c0 = arith.constant 0 : index
    %c0_0 = arith.constant 0 : index
    %8 = vector.load %arg6[%c0, %c0_0] : memref<32x3xi32, #tpu.memory_space<vmem>>, vector<32x3xi32>
    %9 = tpu.iota {dimensions = array<i32: 1>} : vector<32x3xi32>
    %c0_1 = arith.constant 0 : index
    %c0_2 = arith.constant 0 : index
    %10 = vector.load %arg1[%c0_1, %c0_2] : memref<32x16xbf16, #tpu.memory_space<vmem>>, vector<32x16xbf16>
    %11 = arith.extf %10 : vector<32x16xbf16> to vector<32x16xf32>
    %cst = arith.constant 0.000000e+00 : f32
    %12 = vector.shape_cast %5 : vector<32x1xi1> to vector<32x1xi1>
    %13 = vector.broadcast %12 : vector<32x1xi1> to vector<32x16xi1>
    %14 = vector.broadcast %cst : f32 to vector<32x16xf32>
    %15 = arith.select %13, %11, %14 : vector<32x16xi1>, vector<32x16xf32>
    %cst_3 = arith.constant dense<0xFF800000> : vector<32xf32>
    %16 = vector.multi_reduction <maximumf>, %15, %cst_3 [1] : vector<32x16xf32> to vector<32xf32>
    %17 = vector.shape_cast %16 : vector<32xf32> to vector<32x1xf32>
    %18 = vector.broadcast %17 : vector<32x1xf32> to vector<32x16xf32>
    %19 = arith.subf %15, %18 : vector<32x16xf32>
    %20 = math.exp %19 : vector<32x16xf32>
    %cst_4 = arith.constant dense<0.000000e+00> : vector<32xf32>
    %21 = vector.multi_reduction <add>, %20, %cst_4 [1] : vector<32x16xf32> to vector<32xf32>
    %22 = vector.shape_cast %21 : vector<32xf32> to vector<32x1xf32>
    %23 = math.log %22 : vector<32x1xf32>
    %24 = arith.addf %17, %23 : vector<32x1xf32>
    %c0_i32 = arith.constant 0 : i32
    %25 = vector.broadcast %c0_i32 : i32 to vector<32x3xi32>
    %26 = arith.cmpi eq, %9, %25 : vector<32x3xi32>
    %c0_i32_5 = arith.constant 0 : i32
    %27 = vector.broadcast %c0_i32_5 : i32 to vector<32x3xi32>
    %28 = arith.select %26, %8, %27 : vector<32x3xi1>, vector<32x3xi32>
    %cst_6 = arith.constant dense<0> : vector<32xi32>
    %29 = vector.multi_reduction <add>, %28, %cst_6 [1] : vector<32x3xi32> to vector<32xi32>
    %30 = vector.shape_cast %29 : vector<32xi32> to vector<32x1xi32>
    %31 = tpu.iota {dimensions = array<i32: 1>} : vector<32x16xi32>
    %32 = vector.broadcast %30 : vector<32x1xi32> to vector<32x16xi32>
    %33 = arith.cmpi eq, %31, %32 : vector<32x16xi32>
    %34 = arith.extui %33 : vector<32x16xi1> to vector<32x16xi32>
    %35 = arith.sitofp %34 : vector<32x16xi32> to vector<32x16xf32>
    %36 = arith.mulf %15, %35 : vector<32x16xf32>
    %cst_7 = arith.constant dense<0.000000e+00> : vector<32xf32>
    %37 = vector.multi_reduction <add>, %36, %cst_7 [1] : vector<32x16xf32> to vector<32xf32>
    %38 = vector.shape_cast %37 : vector<32xf32> to vector<32x1xf32>
    %39 = arith.subf %24, %38 : vector<32x1xf32>
    %40 = arith.mulf %39, %7 : vector<32x1xf32>
    %41 = vector.shape_cast %40 : vector<32x1xf32> to vector<1x32x1xf32>
    %cst_8 = arith.constant dense<0.000000e+00> : vector<1xf32>
    %42 = vector.multi_reduction <add>, %41, %cst_8 [1, 2] : vector<1x32x1xf32> to vector<1xf32>
    %43 = vector.shape_cast %42 : vector<1xf32> to vector<1x1x1xf32>
    %44 = vector.extract %43[0, 0, 0] : f32 from vector<1x1x1xf32>
    %cst_9 = arith.constant 2.500000e-02 : f32
    %45 = arith.mulf %44, %cst_9 : f32
    %c0_10 = arith.constant 0 : index
    %c0_11 = arith.constant 0 : index
    %46 = vector.load %arg2[%c0_10, %c0_11] : memref<32x16xbf16, #tpu.memory_space<vmem>>, vector<32x16xbf16>
    %47 = arith.extf %46 : vector<32x16xbf16> to vector<32x16xf32>
    %cst_12 = arith.constant 0.000000e+00 : f32
    %48 = vector.shape_cast %5 : vector<32x1xi1> to vector<32x1xi1>
    %49 = vector.broadcast %48 : vector<32x1xi1> to vector<32x16xi1>
    %50 = vector.broadcast %cst_12 : f32 to vector<32x16xf32>
    %51 = arith.select %49, %47, %50 : vector<32x16xi1>, vector<32x16xf32>
    %cst_13 = arith.constant dense<0xFF800000> : vector<32xf32>
    %52 = vector.multi_reduction <maximumf>, %51, %cst_13 [1] : vector<32x16xf32> to vector<32xf32>
    %53 = vector.shape_cast %52 : vector<32xf32> to vector<32x1xf32>
    %54 = vector.broadcast %53 : vector<32x1xf32> to vector<32x16xf32>
    %55 = arith.subf %51, %54 : vector<32x16xf32>
    %56 = math.exp %55 : vector<32x16xf32>
    %cst_14 = arith.constant dense<0.000000e+00> : vector<32xf32>
    %57 = vector.multi_reduction <add>, %56, %cst_14 [1] : vector<32x16xf32> to vector<32xf32>
    %58 = vector.shape_cast %57 : vector<32xf32> to vector<32x1xf32>
    %59 = math.log %58 : vector<32x1xf32>
    %60 = arith.addf %53, %59 : vector<32x1xf32>
    %c1_i32 = arith.constant 1 : i32
    %61 = vector.broadcast %c1_i32 : i32 to vector<32x3xi32>
    %62 = arith.cmpi eq, %9, %61 : vector<32x3xi32>
    %c0_i32_15 = arith.constant 0 : i32
    %63 = vector.broadcast %c0_i32_15 : i32 to vector<32x3xi32>
    %64 = arith.select %62, %8, %63 : vector<32x3xi1>, vector<32x3xi32>
    %cst_16 = arith.constant dense<0> : vector<32xi32>
    %65 = vector.multi_reduction <add>, %64, %cst_16 [1] : vector<32x3xi32> to vector<32xi32>
    %66 = vector.shape_cast %65 : vector<32xi32> to vector<32x1xi32>
    %67 = vector.broadcast %66 : vector<32x1xi32> to vector<32x16xi32>
    %68 = arith.cmpi eq, %31, %67 : vector<32x16xi32>
    %69 = arith.extui %68 : vector<32x16xi1> to vector<32x16xi32>
    %70 = arith.sitofp %69 : vector<32x16xi32> to vector<32x16xf32>
    %71 = arith.mulf %51, %70 : vector<32x16xf32>
    %cst_17 = arith.constant dense<0.000000e+00> : vector<32xf32>
    %72 = vector.multi_reduction <add>, %71, %cst_17 [1] : vector<32x16xf32> to vector<32xf32>
    %73 = vector.shape_cast %72 : vector<32xf32> to vector<32x1xf32>
    %74 = arith.subf %60, %73 : vector<32x1xf32>
    %75 = arith.mulf %74, %7 : vector<32x1xf32>
    %76 = vector.shape_cast %75 : vector<32x1xf32> to vector<1x32x1xf32>
    %cst_18 = arith.constant dense<0.000000e+00> : vector<1xf32>
    %77 = vector.multi_reduction <add>, %76, %cst_18 [1, 2] : vector<1x32x1xf32> to vector<1xf32>
    %78 = vector.shape_cast %77 : vector<1xf32> to vector<1x1x1xf32>
    %79 = vector.extract %78[0, 0, 0] : f32 from vector<1x1x1xf32>
    %cst_19 = arith.constant 2.500000e-02 : f32
    %80 = arith.mulf %79, %cst_19 : f32
    %c0_20 = arith.constant 0 : index
    %c0_21 = arith.constant 0 : index
    %81 = vector.load %arg3[%c0_20, %c0_21] : memref<32x16xbf16, #tpu.memory_space<vmem>>, vector<32x16xbf16>
    %82 = arith.extf %81 : vector<32x16xbf16> to vector<32x16xf32>
    %cst_22 = arith.constant 0.000000e+00 : f32
    %83 = vector.shape_cast %5 : vector<32x1xi1> to vector<32x1xi1>
    %84 = vector.broadcast %83 : vector<32x1xi1> to vector<32x16xi1>
    %85 = vector.broadcast %cst_22 : f32 to vector<32x16xf32>
    %86 = arith.select %84, %82, %85 : vector<32x16xi1>, vector<32x16xf32>
    %cst_23 = arith.constant dense<0xFF800000> : vector<32xf32>
    %87 = vector.multi_reduction <maximumf>, %86, %cst_23 [1] : vector<32x16xf32> to vector<32xf32>
    %88 = vector.shape_cast %87 : vector<32xf32> to vector<32x1xf32>
    %89 = vector.broadcast %88 : vector<32x1xf32> to vector<32x16xf32>
    %90 = arith.subf %86, %89 : vector<32x16xf32>
    %91 = math.exp %90 : vector<32x16xf32>
    %cst_24 = arith.constant dense<0.000000e+00> : vector<32xf32>
    %92 = vector.multi_reduction <add>, %91, %cst_24 [1] : vector<32x16xf32> to vector<32xf32>
    %93 = vector.shape_cast %92 : vector<32xf32> to vector<32x1xf32>
    %94 = math.log %93 : vector<32x1xf32>
    %95 = arith.addf %88, %94 : vector<32x1xf32>
    %c2_i32 = arith.constant 2 : i32
    %96 = vector.broadcast %c2_i32 : i32 to vector<32x3xi32>
    %97 = arith.cmpi eq, %9, %96 : vector<32x3xi32>
    %c0_i32_25 = arith.constant 0 : i32
    %98 = vector.broadcast %c0_i32_25 : i32 to vector<32x3xi32>
    %99 = arith.select %97, %8, %98 : vector<32x3xi1>, vector<32x3xi32>
    %cst_26 = arith.constant dense<0> : vector<32xi32>
    %100 = vector.multi_reduction <add>, %99, %cst_26 [1] : vector<32x3xi32> to vector<32xi32>
    %101 = vector.shape_cast %100 : vector<32xi32> to vector<32x1xi32>
    %102 = vector.broadcast %101 : vector<32x1xi32> to vector<32x16xi32>
    %103 = arith.cmpi eq, %31, %102 : vector<32x16xi32>
    %104 = arith.extui %103 : vector<32x16xi1> to vector<32x16xi32>
    %105 = arith.sitofp %104 : vector<32x16xi32> to vector<32x16xf32>
    %106 = arith.mulf %86, %105 : vector<32x16xf32>
    %cst_27 = arith.constant dense<0.000000e+00> : vector<32xf32>
    %107 = vector.multi_reduction <add>, %106, %cst_27 [1] : vector<32x16xf32> to vector<32xf32>
    %108 = vector.shape_cast %107 : vector<32xf32> to vector<32x1xf32>
    %109 = arith.subf %95, %108 : vector<32x1xf32>
    %110 = arith.mulf %109, %7 : vector<32x1xf32>
    %111 = vector.shape_cast %110 : vector<32x1xf32> to vector<1x32x1xf32>
    %cst_28 = arith.constant dense<0.000000e+00> : vector<1xf32>
    %112 = vector.multi_reduction <add>, %111, %cst_28 [1, 2] : vector<1x32x1xf32> to vector<1xf32>
    %113 = vector.shape_cast %112 : vector<1xf32> to vector<1x1x1xf32>
    %114 = vector.extract %113[0, 0, 0] : f32 from vector<1x1x1xf32>
    %cst_29 = arith.constant 2.500000e-02 : f32
    %115 = arith.mulf %114, %cst_29 : f32
    %c0_30 = arith.constant 0 : index
    %c0_31 = arith.constant 0 : index
    %116 = vector.load %arg4[%c0_30, %c0_31] : memref<32x22xbf16, #tpu.memory_space<vmem>>, vector<32x22xbf16>
    %117 = arith.extf %116 : vector<32x22xbf16> to vector<32x22xf32>
    %cst_32 = arith.constant 0.000000e+00 : f32
    %118 = vector.shape_cast %5 : vector<32x1xi1> to vector<32x1xi1>
    %119 = vector.broadcast %118 : vector<32x1xi1> to vector<32x22xi1>
    %120 = vector.broadcast %cst_32 : f32 to vector<32x22xf32>
    %121 = arith.select %119, %117, %120 : vector<32x22xi1>, vector<32x22xf32>
    %c0_33 = arith.constant 0 : index
    %c0_34 = arith.constant 0 : index
    %122 = vector.load %arg5[%c0_33, %c0_34] : memref<32x32xbf16, #tpu.memory_space<vmem>>, vector<32x32xbf16>
    %123 = arith.extf %122 : vector<32x32xbf16> to vector<32x32xf32>
    %124 = vector.extract_strided_slice %123 {offsets = [0, 10], sizes = [32, 22], strides = [1, 1]} : vector<32x32xf32> to vector<32x22xf32>
    %cst_35 = arith.constant 0.000000e+00 : f32
    %125 = vector.shape_cast %5 : vector<32x1xi1> to vector<32x1xi1>
    %126 = vector.broadcast %125 : vector<32x1xi1> to vector<32x22xi1>
    %127 = vector.broadcast %cst_35 : f32 to vector<32x22xf32>
    %128 = arith.select %126, %124, %127 : vector<32x22xi1>, vector<32x22xf32>
    %cst_36 = arith.constant 0.000000e+00 : f32
    %129 = vector.broadcast %cst_36 : f32 to vector<32x22xf32>
    %130 = arith.maximumf %121, %129 : vector<32x22xf32>
    %131 = arith.mulf %121, %128 : vector<32x22xf32>
    %132 = arith.subf %130, %131 : vector<32x22xf32>
    %133 = math.absf %121 : vector<32x22xf32>
    %cst_37 = arith.constant 0.000000e+00 : f32
    %134 = vector.broadcast %cst_37 : f32 to vector<32x22xf32>
    %135 = arith.subf %134, %133 : vector<32x22xf32>
    %136 = math.exp %135 : vector<32x22xf32>
    %137 = math.log1p %136 : vector<32x22xf32>
    %138 = arith.addf %132, %137 : vector<32x22xf32>
    %139 = vector.broadcast %7 : vector<32x1xf32> to vector<32x22xf32>
    %140 = arith.mulf %138, %139 : vector<32x22xf32>
    %141 = vector.shape_cast %140 : vector<32x22xf32> to vector<1x32x22xf32>
    %cst_38 = arith.constant dense<0.000000e+00> : vector<1xf32>
    %142 = vector.multi_reduction <add>, %141, %cst_38 [1, 2] : vector<1x32x22xf32> to vector<1xf32>
    %143 = vector.shape_cast %142 : vector<1xf32> to vector<1x1x1xf32>
    %144 = vector.extract %143[0, 0, 0] : f32 from vector<1x1x1xf32>
    %cst_39 = arith.constant 2.500000e-02 : f32
    %145 = arith.mulf %144, %cst_39 : f32
    %146 = tpu.iota {dimensions = array<i32: 1>} : vector<8x128xi32>
    %c0_i32_40 = arith.constant 0 : i32
    %147 = vector.broadcast %c0_i32_40 : i32 to vector<8x128xi32>
    %148 = arith.cmpi eq, %146, %147 : vector<8x128xi32>
    %cst_41 = arith.constant 0.000000e+00 : f32
    %149 = vector.broadcast %145 : f32 to vector<8x128xf32>
    %150 = vector.broadcast %cst_41 : f32 to vector<8x128xf32>
    %151 = arith.select %148, %149, %150 : vector<8x128xi1>, vector<8x128xf32>
    %c1_i32_42 = arith.constant 1 : i32
    %152 = vector.broadcast %c1_i32_42 : i32 to vector<8x128xi32>
    %153 = arith.cmpi eq, %146, %152 : vector<8x128xi32>
    %cst_43 = arith.constant 0.000000e+00 : f32
    %154 = vector.broadcast %45 : f32 to vector<8x128xf32>
    %155 = vector.broadcast %cst_43 : f32 to vector<8x128xf32>
    %156 = arith.select %153, %154, %155 : vector<8x128xi1>, vector<8x128xf32>
    %157 = arith.addf %151, %156 : vector<8x128xf32>
    %c2_i32_44 = arith.constant 2 : i32
    %158 = vector.broadcast %c2_i32_44 : i32 to vector<8x128xi32>
    %159 = arith.cmpi eq, %146, %158 : vector<8x128xi32>
    %cst_45 = arith.constant 0.000000e+00 : f32
    %160 = vector.broadcast %80 : f32 to vector<8x128xf32>
    %161 = vector.broadcast %cst_45 : f32 to vector<8x128xf32>
    %162 = arith.select %159, %160, %161 : vector<8x128xi1>, vector<8x128xf32>
    %163 = arith.addf %157, %162 : vector<8x128xf32>
    %c3_i32 = arith.constant 3 : i32
    %164 = vector.broadcast %c3_i32 : i32 to vector<8x128xi32>
    %165 = arith.cmpi eq, %146, %164 : vector<8x128xi32>
    %cst_46 = arith.constant 0.000000e+00 : f32
    %166 = vector.broadcast %115 : f32 to vector<8x128xf32>
    %167 = vector.broadcast %cst_46 : f32 to vector<8x128xf32>
    %168 = arith.select %165, %166, %167 : vector<8x128xi1>, vector<8x128xf32>
    %169 = arith.addf %163, %168 : vector<8x128xf32>
    %c0_47 = arith.constant 0 : index
    %c0_48 = arith.constant 0 : index
    %c0_49 = arith.constant 0 : index
    %170 = vector.load %arg7[%c0_47, %c0_48, %c0_49] : memref<1x8x128xf32, #tpu.memory_space<vmem>>, vector<1x8x128xf32>
    %171 = vector.shape_cast %170 : vector<1x8x128xf32> to vector<8x128xf32>
    %172 = vector.shape_cast %169 : vector<8x128xf32> to vector<1x8x128xf32>
    tpu.vector_store %arg7[%c0_47, %c0_48, %c0_49], %172 {strides = array<i32>} : memref<1x8x128xf32, #tpu.memory_space<vmem>>, vector<1x8x128xf32>,
    return
  }
  func.func @transform_0(%arg0: i32) -> (i32, i32) {
    %c0_i32 = arith.constant 0 : i32
    %c0_i32_0 = arith.constant 0 : i32
    return %arg0, %c0_i32 : i32, i32
  }
  func.func @transform_1(%arg0: i32) -> (i32, i32) {
    %c0_i32 = arith.constant 0 : i32
    %c0_i32_0 = arith.constant 0 : i32
    return %arg0, %c0_i32 : i32, i32
  }
  func.func @transform_2(%arg0: i32) -> (i32, i32) {
    %c0_i32 = arith.constant 0 : i32
    %c0_i32_0 = arith.constant 0 : i32
    return %arg0, %c0_i32 : i32, i32
  }
  func.func @transform_3(%arg0: i32) -> (i32, i32) {
    %c0_i32 = arith.constant 0 : i32
    %c0_i32_0 = arith.constant 0 : i32
    return %arg0, %c0_i32 : i32, i32
  }
  func.func @transform_4(%arg0: i32) -> (i32, i32) {
    %c0_i32 = arith.constant 0 : i32
    %c0_i32_0 = arith.constant 0 : i32
    return %arg0, %c0_i32 : i32, i32
  }
  func.func @transform_5(%arg0: i32) -> (i32, i32) {
    %c0_i32 = arith.constant 0 : i32
    %c0_i32_0 = arith.constant 0 : i32
    return %arg0, %c0_i32 : i32, i32
  }
  func.func @transform_6(%arg0: i32) -> (i32, i32, i32) {
    %c0_i32 = arith.constant 0 : i32
    %c0_i32_0 = arith.constant 0 : i32
    %c0_i32_1 = arith.constant 0 : i32
    return %arg0, %c0_i32, %c0_i32_0 : i32, i32, i32
  }
}

</mosaic_0001>

<bundles_post_ra>
// kernel: tpu_custom_call.1
= control target key start
LH: loop header
LB: loop body
LE: loop exit
PB: predicated region body
PF: predicated region fallthrough
CT: control target
= control target key end

     0   :  { %11 = vsyncpa [#allocation3], 0  ;;  %s2130_s0 = inlined_call_operand.vmem [shape: bf16[40,16], index: 0, kind: input, shape index: {}]   ;;  %s2131_s1 = inlined_call_operand.vmem [shape: bf16[40,16], index: 1, kind: input, shape index: {}]   ;;  %s2132_s2 = inlined_call_operand.vmem [shape: bf16[40,16], index: 2, kind: input, shape index: {}]   ;;  %s2133_s3 = inlined_call_operand.vmem [shape: bf16[40,22], index: 3, kind: input, shape index: {}]   ;;  %s2134_s4 = inlined_call_operand.vmem [shape: bf16[40,32], index: 4, kind: input, shape index: {}]   ;;  %s2135_s5 = inlined_call_operand.vmem [shape: s32[40,3], index: 5, kind: input, shape index: {}]   ;;  %s2136_s6 = inlined_call_operand.hbm [shape: f32[2,8,128], index: 6, kind: output, shape index: {}]  }
   0x1   :  { %13 = vsyncpa [#allocation3 + $0x1], 0  ;;  %s1607_s21 = smov 0   ;;  %s1609_s22 = smov 0  }
   0x2   :  { %s1611_s23 = smov 0   ;;  %s1613_s24 = smov 0  }
   0x3 LB: > { %s1628_s25 = sadd.s32 4294967295, %s1567_s24   ;;  %s1304_s26 = sadd.s32 4294967294, %s1567_s24   ;;  %s1567_s24 = sphi %s1613_s24, %s2146_s24   ;;  %s1563_s23 = sphi %s1611_s23, %s2145_s23   ;;  %s1559_s22 = sphi %s1609_s22, %s2144_s22   ;;  %s1555_s21 = sphi %s1607_s21, %s2143_s21  }
   0x4   : > { %s1632_s27 = sadd.s32 1, %s1567_s24   ;;  %s182_s28 = sadd.s32 1, %s1563_s23 }
   0x5   : > { %s179_s29 = ssub.s32 %s1567_s24, %s1632_s27  ;;  %p192_p0 = scmp.ne.s32.totalorder %s1563_s23, %s1559_s22 }
   0x6   : > { %p180_p1 = scmp.eq.s32.totalorder %s179_s29, 0  ;;  %p193_p2 = scmp.eq.s32.totalorder %s1628_s25, 1 }
   0x7   : > { %p198_p3 = scmp.ne.s32.totalorder %s1559_s22, %s1555_s21  ;;  %p199_p4 = scmp.eq.s32.totalorder %s1304_s26, 1 }
   0x8   : > { %s1643_s30 = scalar_select %p180_p1, %s1563_s23, %s182_s28  }
   0x9   : > { %p1645_p5 = por %p193_p2, %p192_p0  ;;  %p1649_p6 = por %p199_p4, %p198_p3 }
   0xa   : > { %p1307_p7 = scmp.ge.s32.totalorder %s1567_s24, 1  ;;  %p319_p8 = scmp.lt.s32.totalorder %s1567_s24, 3 }
   0xc   : > { %p320_p9 = pnand %p1307_p7, %p319_p8 }
   0xd   : > { %s1309_s9 = sshll.u32 (!%p320_p9), %s1628_s25, 2  ;;  %s1321_s10 = sshll.u32 (!%p320_p9), %s1628_s25, 5  ;;  %v483_v0 = vlaneseq (!%p320_p9)  ;;  %vm527_vm1 = vcmask (!%p320_p9), 130048   ;;  %vm581_vm6 = vcmask (!%p320_p9), 23552  }
   0xe   : > { %323 = sbr.rel (%p320_p9) target bundleno = 717 (0x2cd), region = 44  ;;  %p403_p10 = scmp.lt.s32.totalorder (!%p320_p9), %s1309_s9, 4  ;;  %v488_v1 = vstv (!%p320_p9), %s1321_s10 }
   0xf   : > { %v484_v2 = vshrl.u32 (!%p320_p9), %v483_v0, 7  ;;  %v1718_v32 = vand.u32 (!%p320_p9), 127, %v483_v0  ;;  %s395_s19 = sand.u32 (!%p320_p9), 1, %s1559_s22  }
  0x10   : > { %s1308_s29 = sshll.u32 (!%p320_p9), %s395_s19, 3 }
  0x11   : > { %v1659_v3 = vadd.s32 (!%p320_p9), %v488_v1, %v484_v2  ;;  %v485_v4 = vadd.s32 (!%p320_p9), 8, %v484_v2  ;;  %v486_v8 = vadd.s32 (!%p320_p9), 16, %v484_v2  ;;  %v487_v15 = vadd.s32 (!%p320_p9), 24, %v484_v2 }
  0x12   : > { %vm576_vm5 = vcmp.eq.s32.totalorder (!%p320_p9), %v1718_v32, 0  ;;  %vm748_vm7 = vcmp.eq.s32.totalorder (!%p320_p9), %v1718_v32, 1  ;;  %vm918_vm8 = vcmp.eq.s32.totalorder (!%p320_p9), %v1718_v32, 2 }
  0x13   : > { %v1672_v5 = vadd.s32 (!%p320_p9), %v488_v1, %v485_v4  ;;  %vm493_vm0 = vcmp.lt.s32.totalorder (!%p320_p9), %v1659_v3, 40  ;;  %v1703_v23 = vadd.s32 (!%p320_p9), %v488_v1, %v486_v8  ;;  %v1721_v33 = vadd.s32 (!%p320_p9), %v488_v1, %v487_v15 }
  0x15   : > { %s2148_s9 = smov (!%p403_p10, %s1309_s9), 4  ;;  %vm494_vm2 = vcmp.lt.s32.totalorder %v1672_v5, 40  ;;  %vm495_vm3 = vcmp.lt.s32.totalorder %v1703_v23, 40  ;;  %vm496_vm4 = vcmp.lt.s32.totalorder %v1721_v33, 40 }
  0x16   : > { %s1662_s11 = sshll.u32 %s2148_s9, 2  ;;  %s1320_s26 = sshll.u32 %s2148_s9, 3 }
  0x17   : > { %s420_s14 = scalar_lea.vmem %s2131_s1, %s1662_s11  ;;  %s406_s17 = scalar_lea.vmem %s2130_s0, %s1662_s11 }
  0x18   : > { %v1351_v6 = vld [vmem:[%s420_s14] sm:$0xff]   ;;  %s1679_s20 = scalar_lea.vmem %s2132_s2, %s1662_s11  ;;  %v1383_v24 = vld [vmem:[%s420_s14 + $0x8] sm:$0xff]   ;;  %s1727_s9 = scalar_lea.vmem %s2135_s5, %s1320_s26 }
  0x19   : > { %v1343_v7 = vld [vmem:[%s406_s17] sm:$0xff]   ;;  %v1352_v9 = vunpack.c.l.bf16 %v1351_v6  ;;  %v1353_v11 = vunpack.c.h.bf16 %v1351_v6  ;;  %v1382_v25 = vld [vmem:[%s406_s17 + $0x8] sm:$0xff]   ;;  %v1356_v30 = vunpack.c.l.bf16 %v1383_v24  ;;  %v1357_v46 = vunpack.c.h.bf16 %v1383_v24  ;;  %s462_s13 = scalar_lea.vmem %s2134_s4, %s1662_s11  ;;  %s1570_s14 = smov 118  }
  0x1a   : > { %v1344_v10 = vunpack.c.l.bf16 %v1343_v7  ;;  %v1359_v12 = vld [vmem:[%s1679_s20] sm:$0xff]   ;;  %v1345_v13 = vunpack.c.h.bf16 %v1343_v7  ;;  %v1348_v31 = vunpack.c.l.bf16 %v1382_v25  ;;  %v1384_v34 = vld [vmem:[%s1679_s20 + $0x8] sm:$0xff]   ;;  %v1349_v39 = vunpack.c.h.bf16 %v1382_v25  ;;  %s448_s17 = scalar_lea.vmem %s2133_s3, %s1662_s11 }
  0x1b   : > { %v1361_v14 = vunpack.c.h.bf16 %v1359_v12  ;;  %v1685_v16 = vsel %vm493_vm0, %v1352_v9, 0.0  ;;  %v1693_v18 = vsel %vm494_vm2, %v1353_v11, 0.0  ;;  %v1360_v19 = vunpack.c.l.bf16 %v1359_v12  ;;  %v506_v41 = vld [vmem:[%s1727_s9 + $0x8] sm:$0xff]  ;;  %v505_v42 = vld [vmem:[%s1727_s9] sm:$0xff]  ;;  %v507_v11 = vld [vmem:[%s1727_s9 + $0x10] sm:$0xff] }
  0x1c   : > { %v1689_v17 = vsel %vm493_vm0, %v1344_v10, 0.0  ;;  %v700_v20 = vsel %vm527_vm1, %v1685_v16, -inf  ;;  %v1701_v22 = vsel %vm494_vm2, %v1345_v13, 0.0  ;;  %v703_v26 = vsel %vm527_vm1, %v1693_v18, -inf }
  0x1d   : > { %v528_v21 = vsel %vm527_vm1, %v1689_v17, -inf  ;;  %701 = vmax.xlane.f32.xlu1 %v700_v20  ;;  %v531_v27 = vsel %vm527_vm1, %v1701_v22, -inf  ;;  %v1712_v28 = vsel %vm494_vm2, %v1361_v14, 0.0  ;;  %v1716_v29 = vsel %vm493_vm0, %v1360_v19, 0.0 }
  0x1e   : > { %529 = vmax.xlane.f32.xlu0 %v528_v21  ;;  %v873_v35 = vsel %vm527_vm1, %v1712_v28, -inf  ;;  %v870_v36 = vsel %vm527_vm1, %v1716_v29, -inf  ;;  %v1735_v37 = vsel %vm495_vm3, %v1356_v30, 0.0  ;;  %v1739_v38 = vsel %vm495_vm3, %v1348_v31, 0.0 }
  0x1f   : > { %v1364_v40 = vunpack.c.l.bf16 %v1384_v34  ;;  %v706_v43 = vsel %vm527_vm1, %v1735_v37, -inf  ;;  %v534_v44 = vsel %vm527_vm1, %v1739_v38, -inf  ;;  %v1365_v45 = vunpack.c.h.bf16 %v1384_v34 }
  0x20   : > { %v1751_v47 = vsel %vm496_vm4, %v1349_v39, 0.0  ;;  %v578_v49 = vsel %vm576_vm5, %v506_v41, 0  ;;  %v577_v50 = vsel %vm576_vm5, %v505_v42, 0  ;;  %v1774_v56 = vsel %vm496_vm4, %v1357_v46, 0.0 }
  0x21   : > { %704 = vmax.xlane.f32.xlu1 %v703_v26  ;;  %v1755_v48 = vsel %vm495_vm3, %v1364_v40, 0.0  ;;  %v537_v51 = vsel %vm527_vm1, %v1751_v47, -inf  ;;  %v595_v53 = vsel %vm581_vm6, %v578_v49, 0  ;;  %v582_v54 = vsel %vm581_vm6, %v577_v50, 0 }
  0x22   : > { %532 = vmax.xlane.f32.xlu0 %v531_v27  ;;  %v876_v52 = vsel %vm527_vm1, %v1755_v48, -inf  ;;  %v1770_v55 = vsel %vm496_vm4, %v1365_v45, 0.0  ;;  %v750_v57 = vsel %vm748_vm7, %v506_v41, 0  ;;  %v749_v58 = vsel %vm748_vm7, %v505_v42, 0 }
  0x23   : > { %v597_v59 = vshrl.u32 %v595_v53, 16  ;;  %v584_v60 = vshrl.u32 %v582_v54, 16  ;;  %v879_v61 = vsel %vm527_vm1, %v1770_v55, -inf  ;;  %v709_v62 = vsel %vm527_vm1, %v1774_v56, -inf }
  0x24   : > { %v766_v63 = vsel %vm581_vm6, %v750_v57, 0  ;;  %v753_v0 = vsel %vm581_vm6, %v749_v58, 0  ;;  %v920_v1 = vsel %vm918_vm8, %v506_v41, 0  ;;  %v919_v2 = vsel %vm918_vm8, %v505_v42, 0 }
  0x25   : > { %874 = vmax.xlane.f32.xlu1 %v873_v35  ;;  %v599_v4 = vcvt.s32.f32 %v597_v59  ;;  %v586_v6 = vcvt.s32.f32 %v584_v60  ;;  %v768_v7 = vshrl.u32 %v766_v63, 16  ;;  %v755_v8 = vshrl.u32 %v753_v0, 16 }
  0x26   : > { %871 = vmax.xlane.f32.xlu0 %v870_v36  ;;  %v936_v9 = vsel %vm581_vm6, %v920_v1, 0  ;;  %v923_v10 = vsel %vm581_vm6, %v919_v2, 0  ;;  %v579_v19 = vsel %vm576_vm5, %v507_v11, 0  ;;  %v596_v24 = vand.u32 65535, %v595_v53 }
  0x27   : > { %v770_v12 = vcvt.s32.f32 %v768_v7  ;;  %v757_v13 = vcvt.s32.f32 %v755_v8  ;;  %v938_v14 = vshrl.u32 %v936_v9, 16  ;;  %v925_v15 = vshrl.u32 %v923_v10, 16 }
  0x28   : > { %v583_v25 = vand.u32 65535, %v582_v54  ;;  %v608_v26 = vsel %vm581_vm6, %v579_v19, 0  ;;  %v751_v27 = vsel %vm748_vm7, %v507_v11, 0  ;;  %v598_v30 = vcvt.s32.f32 %v596_v24 }
  0x29   : > { %707 = vmax.xlane.f32.xlu1 %v706_v43  ;;  %v940_v20 = vcvt.s32.f32 %v938_v14  ;;  %v927_v21 = vcvt.s32.f32 %v925_v15  ;;  %v754_v34 = vand.u32 65535, %v753_v0  ;;  %v610_v35 = vshrl.u32 %v608_v26, 16 }
  0x2a   : > { %535 = vmax.xlane.f32.xlu0 %v534_v44  ;;  %v585_v31 = vcvt.s32.f32 %v583_v25  ;;  %v779_v36 = vsel %vm581_vm6, %v751_v27, 0  ;;  %v767_v42 = vand.u32 65535, %v766_v63  ;;  %v921_v43 = vsel %vm918_vm8, %v507_v11, 0  ;;  %v508_v44 = vld [vmem:[%s1727_s9 + $0x18] sm:$0xff] }
  0x2b   : > { %v756_v39 = vcvt.s32.f32 %v754_v34  ;;  %v612_v40 = vcvt.s32.f32 %v610_v35  ;;  %v781_v41 = vshrl.u32 %v779_v36, 16  ;;  %v937_v49 = vand.u32 65535, %v936_v9 }
  0x2c   : > { %v769_v46 = vcvt.s32.f32 %v767_v42  ;;  %v924_v50 = vand.u32 65535, %v923_v10  ;;  %v609_v57 = vand.u32 65535, %v608_v26  ;;  %v752_v60 = vsel %vm748_vm7, %v508_v44, 0 }
  0x2d   : > { %538 = vmax.xlane.f32.xlu1 %v537_v51  ;;  %v783_v45 = vcvt.s32.f32 %v781_v41  ;;  %v949_v51 = vsel %vm581_vm6, %v921_v43, 0  ;;  %v939_v53 = vcvt.s32.f32 %v937_v49  ;;  %v780_v63 = vand.u32 65535, %v779_v36 }
  0x2e   : > { %877 = vmax.xlane.f32.xlu0 %v876_v52  ;;  %v580_v52 = vsel %vm576_vm5, %v508_v44, 0  ;;  %v926_v54 = vcvt.s32.f32 %v924_v50  ;;  %v951_v58 = vshrl.u32 %v949_v51, 16  ;;  %v792_v1 = vsel %vm581_vm6, %v752_v60, 0 }
  0x2f   : > { %v621_v59 = vsel %vm581_vm6, %v580_v52, 0  ;;  %v922_v2 = vsel %vm918_vm8, %v508_v44, 0  ;;  %v950_v7 = vand.u32 65535, %v949_v51  ;;  %v794_v8 = vshrl.u32 %v792_v1, 16 }
  0x30   : > { %v623_v0 = vshrl.u32 %v621_v59, 16  ;;  %v962_v9 = vsel %vm581_vm6, %v922_v2, 0 }
  0x31   : > { %880 = vmax.xlane.f32.xlu1 %v879_v61  ;;  %v611_v61 = vcvt.s32.f32 %v609_v57  ;;  %v952_v10 = vcvt.s32.f32 %v950_v7  ;;  %v796_v11 = vcvt.s32.f32 %v794_v8  ;;  %v963_v19 = vand.u32 65535, %v962_v9 }
  0x32   : > { %710 = vmax.xlane.f32.xlu0 %v709_v62  ;;  %v953_v62 = vcvt.s32.f32 %v951_v58  ;;  %v1569_v7 = vmov 0.0  }
  0x35   : > { %602 = vadd.xlane.f32.xlu1 %v599_v4  ;;  %v782_v4 = vcvt.s32.f32 %v780_v63 }
  0x36   : > { %589 = vadd.xlane.f32.xlu0 %v586_v6  ;;  %v625_v6 = vcvt.s32.f32 %v623_v0 }
  0x39   : > { %773 = vadd.xlane.f32.xlu1 %v770_v12  ;;  %v622_v12 = vand.u32 65535, %v621_v59 }
  0x3a   : > { %760 = vadd.xlane.f32.xlu0 %v757_v13  ;;  %v964_v13 = vshrl.u32 %v962_v9, 16 }
  0x3b   : > { %v624_v14 = vcvt.s32.f32 %v622_v12 }
  0x3c   : > { %v966_v15 = vcvt.s32.f32 %v964_v13 }
  0x3d   : > { %943 = vadd.xlane.f32.xlu1 %v940_v20  ;;  %v793_v20 = vand.u32 65535, %v792_v1 }
  0x3e   : > { %930 = vadd.xlane.f32.xlu0 %v927_v21  ;;  %v965_v21 = vcvt.s32.f32 %v963_v19 }
  0x3f   : > { %v795_v24 = vcvt.s32.f32 %v793_v20 }
  0x41   : > { %600 = vadd.xlane.f32.xlu1 %v598_v30 }
  0x42   : > { %587 = vadd.xlane.f32.xlu0 %v585_v31 }
  0x45   : > { %758 = vadd.xlane.f32.xlu1 %v756_v39 }
  0x46   : > { %615 = vadd.xlane.f32.xlu0 %v612_v40 }
  0x49   : > { %786 = vadd.xlane.f32.xlu1 %v783_v45 }
  0x4a   : > { %771 = vadd.xlane.f32.xlu0 %v769_v46 }
  0x4d   : > { %941 = vadd.xlane.f32.xlu1 %v939_v53 }
  0x4e   : > { %928 = vadd.xlane.f32.xlu0 %v926_v54 }
  0x51   : > { %613 = vadd.xlane.f32.xlu1 %v611_v61 }
  0x52   : > { %956 = vadd.xlane.f32.xlu0 %v953_v62 }
  0x55   : > { %784 = vadd.xlane.f32.xlu1 %v782_v4 }
  0x56   : > { %628 = vadd.xlane.f32.xlu0 %v625_v6 }
  0x59   : > { %954 = vadd.xlane.f32.xlu1 %v952_v10 }
  0x5a   : > { %799 = vadd.xlane.f32.xlu0 %v796_v11 }
  0x5d   : > { %626 = vadd.xlane.f32.xlu1 %v624_v14 }
  0x5e   : > { %969 = vadd.xlane.f32.xlu0 %v966_v15 }
  0x61   : > { %967 = vadd.xlane.f32.xlu1 %v965_v21 }
  0x62   : > { %797 = vadd.xlane.f32.xlu0 %v795_v24 }
  0xaa   : > { %v1813_v25 = vpop.xlane.xlu1 %701 }
  0xab   : > { %v1815_v26 = vpop.xlane.xlu0 %529 }
  0xae   : > { %v1817_v27 = vpop.xlane.xlu1 %704 }
  0xaf   : > { %v1819_v30 = vpop.xlane.xlu0 %532 }
  0xb2   : > { %v1821_v31 = vpop.xlane.xlu1 %874 }
  0xb3   : > { %v1823_v34 = vpop.xlane.xlu0 %871 }
  0xb6   : > { %v1825_v35 = vpop.xlane.xlu1 %707 }
  0xb7   : > { %v1827_v36 = vpop.xlane.xlu0 %535 }
  0xba   : > { %v1829_v39 = vpop.xlane.xlu1 %538 }
  0xbb   : > { %v1831_v40 = vpop.xlane.xlu0 %877 }
  0xbe   : > { %v1833_v41 = vpop.xlane.xlu1 %880 }
  0xbf   : > { %v1835_v42 = vpop.xlane.xlu0 %710 }
  0xc2   : > { %v603_v43 = vpop.xlane.xlu1 %602 }
  0xc3   : > { %v590_v44 = vpop.xlane.xlu0 %589  ;;  %v605_v49 = vcvt.f32.s32 %v603_v43 }
  0xc4   : > { %v592_v52 = vcvt.f32.s32 %v590_v44 }
  0xc5   : > { %v606_v53 = vshll.u32 %v605_v49, 16 }
  0xc6   : > { %v774_v45 = vpop.xlane.xlu1 %773  ;;  %v593_v58 = vshll.u32 %v592_v52, 16 }
  0xc7   : > { %v761_v46 = vpop.xlane.xlu0 %760  ;;  %v776_v0 = vcvt.f32.s32 %v774_v45 }
  0xc8   : > { %v763_v59 = vcvt.f32.s32 %v761_v46 }
  0xc9   : > { %v777_v20 = vshll.u32 %v776_v0, 16 }
  0xca   : > { %v944_v50 = vpop.xlane.xlu1 %943  ;;  %v764_v4 = vshll.u32 %v763_v59, 16 }
  0xcb   : > { %v931_v51 = vpop.xlane.xlu0 %930  ;;  %v946_v13 = vcvt.f32.s32 %v944_v50 }
  0xcc   : > { %v933_v14 = vcvt.f32.s32 %v931_v51 }
  0xcd   : > { %v947_v46 = vshll.u32 %v946_v13, 16 }
  0xce   : > { %v601_v54 = vpop.xlane.xlu1 %600  ;;  %v934_v49 = vshll.u32 %v933_v14, 16 }
  0xcf   : > { %v588_v57 = vpop.xlane.xlu0 %587  ;;  %v604_v60 = vcvt.f32.s32 %v601_v54 }
  0xd0   : > { %v591_v61 = vcvt.f32.s32 %v588_v57 }
  0xd1   : > { %v607_v62 = vadd.s32 %v606_v53, %v604_v60 }
  0xd2   : > { %v594_v63 = vadd.s32 %v593_v58, %v591_v61  ;;  %v759_v1 = vpop.xlane.xlu1 %758 }
  0xd3   : > { %v616_v2 = vpop.xlane.xlu0 %615  ;;  %v762_v6 = vcvt.f32.s32 %v759_v1  ;;  %vm635_vm9 = vcmp.eq.s32.totalorder %v1718_v32, %v607_v62 }
  0xd4   : > { %vm634_vm10 = vcmp.eq.s32.totalorder %v1718_v32, %v594_v63  ;;  %v1327_v8 = vsel %vm635_vm9, 1.0, %v1569_v7  ;;  %v618_v53 = vcvt.f32.s32 %v616_v2 }
  0xd5   : > { %v1326_v9 = vsel %vm634_vm10, 1.0, %v1569_v7  ;;  %v765_v10 = vadd.s32 %v764_v4, %v762_v6  ;;  %v647_v11 = vmul.f32 %v1327_v8, %v1701_v22 }
  0xd6   : > { %v646_v12 = vmul.f32 %v1326_v9, %v1689_v17  ;;  %v787_v15 = vpop.xlane.xlu1 %786  ;;  %v619_v4 = vshll.u32 %v618_v53, 16 }
  0xd7   : > { %v772_v19 = vpop.xlane.xlu0 %771  ;;  %v653_v24 = vsel %vm527_vm1, %v647_v11, 0.0  ;;  %vm805_vm11 = vcmp.eq.s32.totalorder %v1718_v32, %v765_v10  ;;  %v789_v63 = vcvt.f32.s32 %v787_v15 }
  0xd8   : > { %v775_v21 = vcvt.f32.s32 %v772_v19  ;;  %v650_v43 = vsel %vm527_vm1, %v646_v12, 0.0  ;;  %654 = vadd.xlane.f32.xlu1 %v653_v24  ;;  %v1330_v45 = vsel %vm805_vm11, 1.0, %v1569_v7 }
  0xd9   : > { %651 = vadd.xlane.f32.xlu0 %v650_v43  ;;  %v817_v51 = vmul.f32 %v1330_v45, %v1685_v16  ;;  %v790_v12 = vshll.u32 %v789_v63, 16 }
  0xda   : > { %v778_v44 = vadd.s32 %v777_v20, %v775_v21  ;;  %v942_v52 = vpop.xlane.xlu1 %941 }
  0xdb   : > { %v929_v50 = vpop.xlane.xlu0 %928  ;;  %v945_v54 = vcvt.f32.s32 %v942_v52  ;;  %v821_v58 = vsel %vm527_vm1, %v817_v51, 0.0 }
  0xdc   : > { %v932_v57 = vcvt.f32.s32 %v929_v50  ;;  %vm806_vm12 = vcmp.eq.s32.totalorder %v1718_v32, %v778_v44  ;;  %v540_v44 = vsub.f32 %v1689_v17, %v1815_v26 }
  0xdd   : > { %v1331_v59 = vsel %vm806_vm12, 1.0, %v1569_v7  ;;  %v948_v60 = vadd.s32 %v947_v46, %v945_v54  ;;  %822 = vadd.xlane.f32.xlu0 %v821_v58  ;;  %v712_v58 = vsub.f32 %v1685_v16, %v1813_v25 }
  0xde   : > { %v935_v61 = vadd.s32 %v934_v49, %v932_v57  ;;  %v818_v62 = vmul.f32 %v1331_v59, %v1693_v18  ;;  %v614_v0 = vpop.xlane.xlu1 %613  ;;  %v541_v49 = vsub.f32 %v1701_v22, %v1819_v30  ;;  %v544_v59 = vmul.f32 1.442695, %v540_v44 }
  0xdf   : > { %v957_v1 = vpop.xlane.xlu0 %956  ;;  %v617_v6 = vcvt.f32.s32 %v614_v0  ;;  %vm976_vm13 = vcmp.eq.s32.totalorder %v1718_v32, %v948_v60  ;;  %v713_v22 = vsub.f32 %v1693_v18, %v1817_v27  ;;  %v716_v16 = vmul.f32 1.442695, %v712_v58 }
  0xe0   : > { %v824_v2 = vsel %vm527_vm1, %v818_v62, 0.0  ;;  %v1335_v8 = vsel %vm976_vm13, 1.0, %v1569_v7  ;;  %vm975_vm14 = vcmp.eq.s32.totalorder %v1718_v32, %v935_v61  ;;  %v959_v19 = vcvt.f32.s32 %v957_v1 }
  0xe1   : > { %825 = vadd.xlane.f32.xlu1 %v824_v2  ;;  %v620_v9 = vadd.s32 %v619_v4, %v617_v6  ;;  %v988_v10 = vmul.f32 %v1335_v8, %v1712_v28  ;;  %v1334_v11 = vsel %vm975_vm14, 1.0, %v1569_v7  ;;  %v546_v62 = vmul.f32 1.442695, %v541_v49 }
  0xe2   : > { %v785_v13 = vpop.xlane.xlu1 %784  ;;  %v987_v15 = vmul.f32 %v1334_v11, %v1716_v29  ;;  %v960_v53 = vshll.u32 %v959_v19, 16  ;;  %1441 = vpow2.f32 %v544_v59  ;;  %v884_v59 = vsub.f32 %v1755_v48, %v1831_v40 }
  0xe3   : > { %v629_v14 = vpop.xlane.xlu0 %628  ;;  %v788_v20 = vcvt.f32.s32 %v785_v13  ;;  %v994_v21 = vsel %vm527_vm1, %v988_v10, 0.0  ;;  %vm636_vm15 = vcmp.eq.s32.totalorder %v1718_v32, %v620_v9  ;;  %v883_v9 = vsub.f32 %v1712_v28, %v1821_v31 }
  0xe4   : > { %v991_v24 = vsel %vm527_vm1, %v987_v15, 0.0  ;;  %v1328_v43 = vsel %vm636_vm15, 1.0, %v1569_v7  ;;  %v631_v52 = vcvt.f32.s32 %v629_v14  ;;  %v718_v13 = vmul.f32 1.442695, %v713_v22 }
  0xe5   : > { %995 = vadd.xlane.f32.xlu1 %v994_v21  ;;  %v791_v45 = vadd.s32 %v790_v12, %v788_v20  ;;  %992 = vadd.xlane.f32.xlu0 %v991_v24  ;;  %v648_v46 = vmul.f32 %v1328_v43, %v1739_v38  ;;  %1443 = vpow2.f32 %v546_v62  ;;  %v882_v14 = vsub.f32 %v1716_v29, %v1823_v34 }
  0xe6   : > { %v955_v50 = vpop.xlane.xlu1 %954  ;;  %v632_v63 = vshll.u32 %v631_v52, 16  ;;  %1445 = vpow2.f32 %v716_v16  ;;  %v888_v43 = vmul.f32 1.442695, %v883_v9  ;;  %vm1140_vm13 = vcmask 179200  }
  0xe7   : > { %v800_v51 = vpop.xlane.xlu0 %799  ;;  %v958_v54 = vcvt.f32.s32 %v955_v50  ;;  %v656_v57 = vsel %vm527_vm1, %v648_v46, 0.0  ;;  %vm807_vm6 = vcmp.eq.s32.totalorder %v1718_v32, %v791_v45  ;;  %v714_v45 = vsub.f32 %v1735_v37, %v1825_v35 }
  0xe8   : > { %v1332_v17 = vsel %vm807_vm6, 1.0, %v1569_v7  ;;  %v802_v0 = vcvt.f32.s32 %v800_v51  ;;  %1447 = vpow2.f32 %v718_v13  ;;  %v886_v52 = vmul.f32 1.442695, %v882_v14 }
  0xe9   : > { %v961_v60 = vadd.s32 %v960_v53, %v958_v54  ;;  %657 = vadd.xlane.f32.xlu0 %v656_v57  ;;  %v819_v61 = vmul.f32 %v1332_v17, %v1735_v37  ;;  %v542_v50 = vsub.f32 %v1739_v38, %v1827_v36  ;;  %1449 = vpow2.f32 %v888_v43  ;;  %v1386_v43 = vld [vmem:[%s462_s13 + $0x8] sm:$0xff]  }
  0xea   : > { %v627_v1 = vpop.xlane.xlu1 %626  ;;  %v803_v15 = vshll.u32 %v802_v0, 16  ;;  %v720_v54 = vmul.f32 1.442695, %v714_v45  ;;  %v543_v57 = vsub.f32 %v1751_v47, %v1829_v39  ;;  %1451 = vpow2.f32 %v886_v52  ;;  %v1375_v45 = vld [vmem:[%s462_s13] sm:$0xff]   ;;  %s1339_s13 = sshll.u32 %s1628_s25, 7  ;;  %s1571_s25 = smov [#allocation2]  }
  0xeb   : > { %v970_v4 = vpop.xlane.xlu0 %969  ;;  %v630_v6 = vcvt.f32.s32 %v627_v1  ;;  %v827_v8 = vsel %vm527_vm1, %v819_v61, 0.0  ;;  %vm977_vm9 = vcmp.eq.s32.totalorder %v1718_v32, %v961_v60  ;;  %v548_v17 = vmul.f32 1.442695, %v542_v50 }
  0xec   : > { %v972_v2 = vcvt.f32.s32 %v970_v4  ;;  %828 = vadd.xlane.f32.xlu1 %v827_v8  ;;  %v1336_v10 = vsel %vm977_vm9, 1.0, %v1569_v7  ;;  %v1442_v60 = vpop.eup %1441  ;;  %1453 = vpow2.f32 %v720_v54  ;;  %v890_v0 = vmul.f32 1.442695, %v884_v59 }
  0xed   : > { %v633_v18 = vadd.s32 %v632_v63, %v630_v6  ;;  %v989_v12 = vmul.f32 %v1336_v10, %v1755_v48  ;;  %v550_v63 = vmul.f32 1.442695, %v543_v57  ;;  %1455 = vpow2.f32 %v548_v17 }
  0xee   : > { %v973_v11 = vshll.u32 %v972_v2, 16  ;;  %v968_v19 = vpop.xlane.xlu1 %967  ;;  %v715_v1 = vsub.f32 %v1774_v56, %v1835_v42  ;;  %v552_v48 = vsel %vm527_vm1, %v1442_v60, 0.0  ;;  %vm1166_vm14 = vcmp.eq.s32.totalorder %v1718_v32, 3 }
  0xef   : > { %v798_v20 = vpop.xlane.xlu0 %797  ;;  %v971_v21 = vcvt.f32.s32 %v968_v19  ;;  %v997_v28 = vsel %vm527_vm1, %v989_v12, 0.0  ;;  %vm637_vm10 = vcmp.eq.s32.totalorder %v1718_v32, %v633_v18  ;;  %v1444_v62 = vpop.eup %1443  ;;  %1457 = vpow2.f32 %v550_v63 }
  0xf0   : > { %v801_v24 = vcvt.f32.s32 %v798_v20  ;;  %998 = vadd.xlane.f32.xlu0 %v997_v28  ;;  %v1329_v44 = vsel %vm637_vm10, 1.0, %v1569_v7  ;;  %v555_v4 = vsel %vm527_vm1, %v1444_v62, 0.0  ;;  %1459 = vpow2.f32 %v890_v0 }
  0xf1   : > { %v974_v46 = vadd.s32 %v973_v11, %v971_v21  ;;  %v649_v29 = vmul.f32 %v1329_v44, %v1751_v47  ;;  %v1446_v47 = vpop.eup %1445  ;;  %v722_v8 = vmul.f32 1.442695, %v715_v1  ;;  %v1380_v44 = vunpack.c.l.bf16 %v1386_v43 }
  0xf2   : > { %v804_v49 = vadd.s32 %v803_v15, %v801_v24  ;;  %v1448_v6 = vpop.eup %1447  ;;  %v724_v9 = vsel %vm527_vm1, %v1446_v47, 0.0 }
  0xf3   : > { %v659_v51 = vsel %vm527_vm1, %v649_v29, 0.0  ;;  %vm978_vm11 = vcmp.eq.s32.totalorder %v1718_v32, %v974_v46  ;;  %v1450_v2 = vpop.eup %1449  ;;  %v727_v16 = vsel %vm527_vm1, %v1448_v6, 0.0  ;;  %1461 = vpow2.f32 %v722_v8 }
  0xf4   : > { %vm808_vm12 = vcmp.eq.s32.totalorder %v1718_v32, %v804_v49  ;;  %660 = vadd.xlane.f32.xlu1 %v659_v51  ;;  %v1337_v53 = vsel %vm978_vm11, 1.0, %v1569_v7  ;;  %v1452_v10 = vpop.eup %1451  ;;  %v897_v18 = vsel %vm527_vm1, %v1450_v2, 0.0  ;;  %v1050_v46 = vsel %vm495_vm3, %v1380_v44, 0.0 }
  0xf5   : > { %v1333_v37 = vsel %vm808_vm12, 1.0, %v1569_v7  ;;  %v990_v58 = vmul.f32 %v1337_v53, %v1770_v55  ;;  %v894_v11 = vsel %vm527_vm1, %v1452_v10, 0.0  ;;  %v1376_v49 = vunpack.c.l.bf16 %v1375_v45 }
  0xf6   : > { %v820_v38 = vmul.f32 %v1333_v37, %v1774_v56  ;;  %v1454_v56 = vpop.eup %1453  ;;  %v1377_v29 = vunpack.c.h.bf16 %v1375_v45  ;;  %v885_v53 = vsub.f32 %v1770_v55, %v1833_v41 }
  0xf7   : > { %v1000_v61 = vsel %vm527_vm1, %v990_v58, 0.0  ;;  %v1456_v12 = vpop.eup %1455  ;;  %v730_v14 = vsel %vm527_vm1, %v1454_v56, 0.0  ;;  %v1048_v52 = vsel %vm493_vm0, %v1376_v49, 0.0  ;;  %v1381_v58 = vunpack.c.h.bf16 %v1386_v43 }
  0xf8   : > { %v830_v22 = vsel %vm527_vm1, %v820_v38, 0.0  ;;  %1001 = vadd.xlane.f32.xlu1 %v1000_v61  ;;  %v558_v15 = vsel %vm527_vm1, %v1456_v12, 0.0  ;;  %v1049_v50 = vsel %vm494_vm2, %v1377_v29, 0.0  ;;  %v892_v37 = vmul.f32 1.442695, %v885_v53 }
  0xf9   : > { %831 = vadd.xlane.f32.xlu0 %v830_v22  ;;  %v1458_v13 = vpop.eup %1457  ;;  %v1436_v51 = vpack.i.bf16 %v1049_v50, %v1048_v52  ;;  %v1051_v38 = vsel %vm496_vm4, %v1381_v58, 0.0 }
  0xfa   : > { %v1460_v19 = vpop.eup %1459  ;;  %v561_v20 = vsel %vm527_vm1, %v1458_v13, 0.0  ;;  %1463 = vpow2.f32 %v892_v37  ;;  %v1385_v13 = vld [vmem:[%s448_s17 + $0x8] sm:$0xff]  }
  0xfb   : > { %v900_v21 = vsel %vm527_vm1, %v1460_v19, 0.0 }
  0xfc   : > { %556 = vadd.xlane.f32.xlu1 %v555_v4 }
  0xfd   : > { %553 = vadd.xlane.f32.xlu0 %v552_v48  ;;  %v1462_v24 = vpop.eup %1461 }
  0xfe   : > { %v733_v28 = vsel %vm527_vm1, %v1462_v24, 0.0 }
 0x100   : > { %728 = vadd.xlane.f32.xlu1 %v727_v16 }
 0x101   : > { %725 = vadd.xlane.f32.xlu0 %v724_v9 }
 0x104   : > { %898 = vadd.xlane.f32.xlu1 %v897_v18  ;;  %v1464_v54 = vpop.eup %1463 }
 0x105   : > { %895 = vadd.xlane.f32.xlu0 %v894_v11  ;;  %v903_v57 = vsel %vm527_vm1, %v1464_v54, 0.0 }
 0x108   : > { %731 = vadd.xlane.f32.xlu1 %v730_v14 }
 0x109   : > { %559 = vadd.xlane.f32.xlu0 %v558_v15  ;;  %v1367_v15 = vld [vmem:[%s448_s17] sm:$0xff]  }
 0x10a   : > { %v1368_v44 = vunpack.c.l.bf16 %v1367_v15  ;;  %v1369_v45 = vunpack.c.h.bf16 %v1367_v15 }
 0x10c   : > { %562 = vadd.xlane.f32.xlu1 %v561_v20  ;;  %v1372_v20 = vunpack.c.l.bf16 %v1385_v13  ;;  %v1970_v54 = vsel %vm493_vm0, %v1368_v44, 0.0 }
 0x10d   : > { %901 = vadd.xlane.f32.xlu0 %v900_v21  ;;  %v1080_v5 = vand.u32 2147483647, %v1970_v54 }
 0x10e   : > { %v1965_v50 = vsel %vm495_vm3, %v1372_v20, 0.0 }
 0x111   : > { %734 = vadd.xlane.f32.xlu0 %v733_v28 }
 0x11d   : > { %1064 = vrot.lane.b32.xlu1 %v1050_v46, %s1570_s14 }
 0x127   : > { %1437 = vrot.lane.b32.xlu0 %v1436_v51, %s1570_s14 }
 0x141   : > { %904 = vadd.xlane.f32.xlu1 %v903_v57 }
 0x152   : > { %1066 = vrot.lane.b32.xlu1 %v1051_v38, %s1570_s14  ;;  %v1980_v38 = vsel %vm494_vm2, 1.0, %v1569_v7  ;;  %s397_s14 = scalar_lea.vmem [#allocation2], %s1308_s29 }
 0x153   : > { %s1185_s15 = sshll.u32 %s397_s14, 4  ;;  %s2090_s15 = int_to_ptr.vmem [resolvable:$true] %s1185_s15 }
 0x165   : > { %v1935_v59 = vpop.xlane.xlu1 %654 }
 0x166   : > { %v1933_v17 = vpop.xlane.xlu0 %651 }
 0x16a   : > { %v1937_v60 = vpop.xlane.xlu0 %822 }
 0x16e   : > { %v1939_v61 = vpop.xlane.xlu1 %825 }
 0x172   : > { %v1941_v55 = vpop.xlane.xlu0 %992  ;;  %v1943_v22 = vpop.xlane.xlu1 %995 }
 0x176   : > { %v1945_v62 = vpop.xlane.xlu0 %657 }
 0x179   : > { %v1947_v63 = vpop.xlane.xlu1 %828 }
 0x17d   : > { %v1949_v47 = vpop.xlane.xlu0 %998 }
 0x181   : > { %v1951_v0 = vpop.xlane.xlu1 %660 }
 0x185   : > { %v1953_v1 = vpop.xlane.xlu1 %1001 }
 0x186   : > { %v1955_v4 = vpop.xlane.xlu0 %831 }
 0x189   : > { %v557_v48 = vpop.xlane.xlu1 %556 }
 0x18a   : > { %v554_v6 = vpop.xlane.xlu0 %553  ;;  %1465 = vlog2.f32 %v557_v48 }
 0x18b   : > { %1467 = vlog2.f32 %v554_v6 }
 0x18d   : > { %v729_v2 = vpop.xlane.xlu1 %728 }
 0x18e   : > { %v726_v8 = vpop.xlane.xlu0 %725  ;;  %1469 = vlog2.f32 %v729_v2  ;;  %v1988_v2 = vsel %vm493_vm0, 1.0, %v1569_v7  ;;  %vm670_vm0 = vcmask 7168  }
 0x18f   : > { %1471 = vlog2.f32 %v726_v8 }
 0x191   : > { %v899_v16 = vpop.xlane.xlu1 %898 }
 0x192   : > { %v896_v9 = vpop.xlane.xlu0 %895  ;;  %1473 = vlog2.f32 %v899_v16  ;;  %v1082_v16 = vand.u32 2147483647, %v1965_v50 }
 0x193   : > { %1475 = vlog2.f32 %v896_v9  ;;  %v1373_v9 = vunpack.c.h.bf16 %v1385_v13 }
 0x194   : > { %v1466_v10 = vpop.eup %1465 }
 0x195   : > { %v1468_v56 = vpop.eup %1467  ;;  %v567_v18 = vmul.f32 0.6931472, %v1466_v10  ;;  %v732_v11 = vpop.xlane.xlu1 %731 }
 0x196   : > { %v560_v12 = vpop.xlane.xlu0 %559  ;;  %v565_v14 = vmul.f32 0.6931472, %v1468_v56  ;;  %1477 = vlog2.f32 %v732_v11 }
 0x197   : > { %1479 = vlog2.f32 %v560_v12  ;;  %v573_v24 = vadd.f32 %v567_v18, %v1819_v30 }
 0x198   : > { %v1470_v19 = vpop.eup %1469  ;;  %v572_v46 = vadd.f32 %v565_v14, %v1815_v26  ;;  %v1974_v26 = vsel %vm494_vm2, %v1369_v45, 0.0 }
 0x199   : > { %v1472_v21 = vpop.eup %1471  ;;  %v563_v28 = vpop.xlane.xlu1 %562  ;;  %v739_v49 = vmul.f32 0.6931472, %v1470_v19  ;;  %v663_v53 = vsub.f32 %v573_v24, %v1935_v59  ;;  %v2006_v19 = vsel %vm495_vm3, 1.0, %v1569_v7 }
 0x19a   : > { %v902_v43 = vpop.xlane.xlu0 %901  ;;  %1481 = vlog2.f32 %v563_v28  ;;  %v737_v29 = vmul.f32 0.6931472, %v1472_v21  ;;  %v662_v57 = vsub.f32 %v572_v46, %v1933_v17 }
 0x19b   : > { %1483 = vlog2.f32 %v902_v43  ;;  %v745_v59 = vadd.f32 %v739_v49, %v1817_v27 }
 0x19c   : > { %v1474_v52 = vpop.eup %1473  ;;  %v744_v48 = vadd.f32 %v737_v29, %v1813_v25  ;;  %v1081_v25 = vand.u32 2147483647, %v1974_v26  ;;  %v666_v11 = vmul.f32 %v1988_v2, %v662_v57 }
 0x19d   : > { %v1476_v51 = vpop.eup %1475  ;;  %v909_v37 = vmul.f32 0.6931472, %v1474_v52  ;;  %v1084_v52 = vsub.f32 0.0, %v1080_v5 }
 0x19e   : > { %v735_v30 = vpop.xlane.xlu0 %734  ;;  %v907_v58 = vmul.f32 0.6931472, %v1476_v51  ;;  %v833_v12 = vsub.f32 %v744_v48, %v1937_v60  ;;  %v671_v23 = vsel %vm670_vm0, %v666_v11, 0.0 }
 0x19f   : > { %1485 = vlog2.f32 %v735_v30  ;;  %v915_v6 = vadd.f32 %v909_v37, %v1821_v31  ;;  %v667_v31 = vmul.f32 %v1980_v38, %v663_v53  ;;  %v1085_v37 = vsub.f32 0.0, %v1081_v25 }
 0x1a0   : > { %v1478_v8 = vpop.eup %1477  ;;  %v914_v17 = vadd.f32 %v907_v58, %v1823_v34  ;;  %v834_v34 = vsub.f32 %v745_v59, %v1939_v61  ;;  %v837_v45 = vmul.f32 %v1988_v2, %v833_v12 }
 0x1a1   : > { %v1480_v10 = vpop.eup %1479  ;;  %v1004_v27 = vsub.f32 %v915_v6, %v1943_v22  ;;  %v741_v56 = vmul.f32 0.6931472, %v1478_v8  ;;  %v672_v21 = vsel %vm670_vm0, %v667_v31, 0.0  ;;  %v1088_v8 = vmul.f32 1.442695, %v1084_v52 }
 0x1a2   : > { %v1003_v3 = vsub.f32 %v914_v17, %v1941_v55  ;;  %v569_v18 = vmul.f32 0.6931472, %v1480_v10  ;;  %v2010_v55 = vsel %vm496_vm4, %v1373_v9, 0.0  ;;  %v838_v46 = vmul.f32 %v1980_v38, %v834_v34 }
 0x1a3   : > { %v746_v13 = vadd.f32 %v741_v56, %v1825_v35  ;;  %v1008_v14 = vmul.f32 %v1980_v38, %v1004_v27  ;;  %v673_v58 = vadd.f32 %v672_v21, %v671_v23  ;;  %v1090_v5 = vmul.f32 1.442695, %v1085_v37 }
 0x1a4   : > { %v1482_v22 = vpop.eup %1481  ;;  %v574_v15 = vadd.f32 %v569_v18, %v1827_v36  ;;  %v1007_v61 = vmul.f32 %v1988_v2, %v1003_v3  ;;  %v842_v6 = vsel %vm670_vm0, %v838_v46, 0.0  ;;  %v1086_v27 = vsub.f32 0.0, %v1082_v16 }
 0x1a5   : > { %v1484_v20 = vpop.eup %1483  ;;  %v835_v60 = vsub.f32 %v746_v13, %v1947_v63  ;;  %v571_v35 = vmul.f32 0.6931472, %v1482_v22  ;;  %v1012_v24 = vsel %vm670_vm0, %v1008_v14, 0.0  ;;  %1487 = vpow2.f32 %v1088_v8 }
 0x1a6   : > { %v664_v36 = vsub.f32 %v574_v15, %v1945_v62  ;;  %v911_v28 = vmul.f32 0.6931472, %v1484_v20  ;;  %v1011_v43 = vsel %vm670_vm0, %v1007_v61, 0.0  ;;  %v2026_v62 = vsel %vm496_vm4, 1.0, %v1569_v7 }
 0x1a7   : > { %v575_v44 = vadd.f32 %v571_v35, %v1829_v39  ;;  %v1013_v49 = vadd.f32 %v1012_v24, %v1011_v43  ;;  %v839_v30 = vmul.f32 %v2006_v19, %v835_v60  ;;  %v841_v7 = vsel %vm670_vm0, %v837_v45, 0.0 }
 0x1a8   : > { %v916_v29 = vadd.f32 %v911_v28, %v1831_v40  ;;  %v668_v51 = vmul.f32 %v2006_v19, %v664_v36  ;;  %v1083_v40 = vand.u32 2147483647, %v2010_v55  ;;  %1489 = vpow2.f32 %v1090_v5  ;;  %v1438_v36 = vpop.permute.xlu0 %1437  ;;  %v1065_v28 = vpop.permute.xlu1 %1064 }
 0x1a9   : > { %v1486_v63 = vpop.eup %1485  ;;  %v665_v39 = vsub.f32 %v575_v44, %v1951_v0  ;;  %v844_v10 = vsel %vm670_vm0, %v839_v30, 0.0  ;;  %v1092_v12 = vmul.f32 1.442695, %v1086_v27  ;;  %v1440_v23 = vunpack.i.h.bf16 %v1438_v36 }
 0x1aa   : > { %v743_v53 = vmul.f32 0.6931472, %v1486_v63  ;;  %v1005_v57 = vsub.f32 %v916_v29, %v1949_v47  ;;  %v674_v59 = vsel %vm670_vm0, %v668_v51, 0.0  ;;  %v1087_v3 = vsub.f32 0.0, %v1083_v40 }
 0x1ab   : > { %v669_v33 = vmul.f32 %v2026_v62, %v665_v39  ;;  %v675_v17 = vadd.f32 %v674_v59, %v673_v58  ;;  %1491 = vpow2.f32 %v1092_v12  ;;  %v1439_v43 = vunpack.i.l.bf16 %v1438_v36 }
 0x1ac   : > { %v747_v48 = vadd.f32 %v743_v53, %v1835_v42  ;;  %v1009_v0 = vmul.f32 %v2006_v19, %v1005_v57  ;;  %v843_v42 = vadd.f32 %v842_v6, %v841_v7  ;;  %v1094_v13 = vmul.f32 1.442695, %v1087_v3 }
 0x1ad   : > { %v676_v47 = vsel %vm670_vm0, %v669_v33, 0.0  ;;  %v1052_v51 = vmax.f32 %v1970_v54, 0.0  ;;  %v1053_v37 = vmax.f32 %v1974_v26, 0.0  ;;  %v1073_v30 = vmul.f32 %v1440_v23, %v1974_v26 }
 0x1ae   : > { %v836_v9 = vsub.f32 %v747_v48, %v1955_v4  ;;  %v677_v56 = vadd.f32 %v676_v47, %v675_v17  ;;  %v1014_v25 = vsel %vm670_vm0, %v1009_v0, 0.0  ;;  %v845_v11 = vadd.f32 %v844_v10, %v843_v42 }
 0x1af   : > { %v2044_v18 = vadd.f32 %v1014_v25, %v1013_v49  ;;  %1493 = vpow2.f32 %v1094_v13  ;;  %v1488_v16 = vpop.eup %1487  ;;  %v1072_v57 = vmul.f32 %v1439_v43, %v1970_v54  ;;  %v1077_v5 = vsub.f32 %v1053_v37, %v1073_v30 }
 0x1b0   : > { %v840_v31 = vmul.f32 %v2026_v62, %v836_v9  ;;  %678 = vadd.xlane.f32.xlu1 %v677_v56  ;;  %v1096_v22 = vadd.f32 1.0, %v1488_v16  ;;  %v1099_v21 = vmul.f32 -0.5, %v1488_v16  ;;  %v1102_v63 = vand.u32 2147483647, %v1488_v16 }
 0x1b1   : > { %v1076_v54 = vsub.f32 %v1052_v51, %v1072_v57  ;;  %v1054_v56 = vmax.f32 %v1965_v50, 0.0  ;;  %v1074_v42 = vmul.f32 %v1065_v28, %v1965_v50  ;;  %v1055_v25 = vmax.f32 %v2010_v55, 0.0 }
 0x1b2   : > { %v846_v34 = vsel %vm670_vm0, %v840_v31, 0.0  ;;  %v1490_v14 = vpop.eup %1489  ;;  %1495 = vlog2.f32 %v1096_v22  ;;  %v1100_v45 = vadd.f32 1.0, %v1099_v21  ;;  %vm2051_vm1 = vcmp.lt.f32.partialorder %v1102_v63, 0.0004427343 }
 0x1b3   : > { %v847_v4 = vadd.f32 %v846_v34, %v845_v11  ;;  %v1105_v15 = vadd.f32 1.0, %v1490_v14  ;;  %v1108_v24 = vmul.f32 -0.5, %v1490_v14  ;;  %v1111_v29 = vand.u32 2147483647, %v1490_v14 }
 0x1b4   : > { %v1101_v59 = vmul.f32 %v1488_v16, %v1100_v45  ;;  %v1078_v16 = vsub.f32 %v1054_v56, %v1074_v42 }
 0x1b5   : > { %848 = vadd.xlane.f32.xlu0 %v847_v4  ;;  %v1492_v61 = vpop.eup %1491  ;;  %1497 = vlog2.f32 %v1105_v15  ;;  %v1109_v46 = vadd.f32 1.0, %v1108_v24  ;;  %vm2055_vm2 = vcmp.lt.f32.partialorder %v1111_v29, 0.0004427343 }
 0x1b6   : > { %v1114_v60 = vadd.f32 1.0, %v1492_v61  ;;  %v1117_v52 = vmul.f32 -0.5, %v1492_v61  ;;  %v1120_v26 = vand.u32 2147483647, %v1492_v61 }
 0x1b7   : > { %v1110_v48 = vmul.f32 %v1490_v14, %v1109_v46 }
 0x1b8   : > { %1499 = vlog2.f32 %v1114_v60  ;;  %v1118_v8 = vadd.f32 1.0, %v1117_v52  ;;  %vm1121_vm3 = vcmp.lt.f32.partialorder %v1120_v26, 0.0004427343 }
 0x1b9   : > { %v1494_v20 = vpop.eup %1493 }
 0x1ba   : > { %v1123_v35 = vadd.f32 1.0, %v1494_v20  ;;  %v1126_v53 = vmul.f32 -0.5, %v1494_v20  ;;  %v1129_v47 = vand.u32 2147483647, %v1494_v20  ;;  %v1119_v11 = vmul.f32 %v1492_v61, %v1118_v8 }
 0x1bc   : > { %1501 = vlog2.f32 %v1123_v35  ;;  %v1496_v44 = vpop.eup %1495  ;;  %v1127_v17 = vadd.f32 1.0, %v1126_v53  ;;  %vm1130_vm4 = vcmp.lt.f32.partialorder %v1129_v47, 0.0004427343 }
 0x1bd   : > { %v1098_v39 = vmul.f32 0.6931472, %v1496_v44 }
 0x1be   : > { %v1128_v12 = vmul.f32 %v1494_v20, %v1127_v17 }
 0x1bf   : > { %v1498_v49 = vpop.eup %1497  ;;  %v1104_v10 = vsel %vm2051_vm1, %v1101_v59, %v1098_v39 }
 0x1c0   : > { %v1107_v40 = vmul.f32 0.6931472, %v1498_v49  ;;  %v1132_v13 = vadd.f32 %v1104_v10, %v1076_v54 }
 0x1c2   : > { %v1500_v6 = vpop.eup %1499  ;;  %v1113_v27 = vsel %vm2055_vm2, %v1110_v48, %v1107_v40  ;;  %v1136_v50 = vmul.f32 %v1988_v2, %v1132_v13 }
 0x1c3   : > { %v1116_v3 = vmul.f32 0.6931472, %v1500_v6  ;;  %v1133_v4 = vadd.f32 %v1113_v27, %v1077_v5 }
 0x1c4   : > { %v1141_v36 = vsel %vm1140_vm13, %v1136_v50, 0.0 }
 0x1c5   : > { %v1122_v15 = vsel %vm1121_vm3, %v1119_v11, %v1116_v3  ;;  %v1137_v21 = vmul.f32 %v1980_v38, %v1133_v4 }
 0x1c6   : > { %v1502_v0 = vpop.eup %1501  ;;  %v1134_v24 = vadd.f32 %v1122_v15, %v1078_v16 }
 0x1c7   : > { %v1125_v34 = vmul.f32 0.6931472, %v1502_v0  ;;  %v1142_v28 = vsel %vm1140_vm13, %v1137_v21, 0.0 }
 0x1c8   : > { %v1138_v43 = vmul.f32 %v2006_v19, %v1134_v24  ;;  %v1143_v45 = vadd.f32 %v1142_v28, %v1141_v36 }
 0x1c9   : > { %v1131_v60 = vsel %vm1130_vm4, %v1128_v12, %v1125_v34 }
 0x1ca   : > { %v1144_v46 = vsel %vm1140_vm13, %v1138_v43, 0.0 }
 0x1ce   : > { %v905_v58 = vpop.xlane.xlu1 %904 }
 0x1cf   : > { %1503 = vlog2.f32 %v905_v58 }
 0x1d2   : > { %v1067_v9 = vpop.permute.xlu1 %1066 }
 0x1d3   : > { %v1075_v31 = vmul.f32 %v1067_v9, %v2010_v55 }
 0x1d5   : > { %v1079_v14 = vsub.f32 %v1055_v25, %v1075_v31 }
 0x1d7   : > { %v1135_v61 = vadd.f32 %v1131_v60, %v1079_v14 }
 0x1d9   : > { %v1504_v22 = vpop.eup %1503  ;;  %v1139_v44 = vmul.f32 %v2026_v62, %v1135_v61 }
 0x1da   : > { %v913_v35 = vmul.f32 0.6931472, %v1504_v22 }
 0x1db   : > { %v1146_v49 = vsel %vm1140_vm13, %v1139_v44, 0.0 }
 0x1dc   : > { %v917_v55 = vadd.f32 %v913_v35, %v1833_v41  ;;  %v1145_v41 = vadd.f32 %v1144_v46, %v1143_v45 }
 0x1de   : > { %v1006_v20 = vsub.f32 %v917_v55, %v1953_v1  ;;  %v1147_v63 = vadd.f32 %v1146_v49, %v1145_v41 }
 0x1e0   : > { %v1010_v23 = vmul.f32 %v2026_v62, %v1006_v20 }
 0x1e2   : > { %v1016_v2 = vsel %vm670_vm0, %v1010_v23, 0.0 }
 0x1e3   : > { %v1017_v38 = vadd.f32 %v1016_v2, %v2044_v18 }
 0x1e5   : > { %1018 = vadd.xlane.f32.xlu0 %v1017_v38 }
 0x1e9   : > { %1148 = vadd.xlane.f32.xlu0 %v1147_v63 }
 0x23d   : > { %v679_v1 = vpop.xlane.xlu1 %678 }
 0x23e   : > { %v680_v29 = vrot.slane %v679_v1, 4 }
 0x240   : > { %v681_v52 = vadd.f32 %v680_v29, %v679_v1 }
 0x242   : > { %v849_v51 = vpop.xlane.xlu0 %848  ;;  %v682_v53 = vrot.slane %v681_v52, 2 }
 0x243   : > { %v850_v37 = vrot.slane %v849_v51, 4 }
 0x244   : > { %v683_v39 = vadd.f32 %v682_v53, %v681_v52 }
 0x245   : > { %v851_v19 = vadd.f32 %v850_v37, %v849_v51 }
 0x246   : > { %v684_v30 = vrot.slane %v683_v39, 1 }
 0x247   : > { %v852_v62 = vrot.slane %v851_v19, 2 }
 0x248   : > { %v685_v57 = vadd.f32 %v684_v30, %v683_v39 }
 0x249   : > { %v853_v58 = vadd.f32 %v852_v62, %v851_v19 }
 0x24a   : > { %1387 = vpush %v685_v57 }
 0x24b   : > { %v854_v18 = vrot.slane %v853_v58, 1 }
 0x24d   : > { %v855_v59 = vadd.f32 %v854_v18, %v853_v58 }
 0x24f   : > { %1389 = vpush %v855_v59 }
 0x272   : > { %v1019_v40 = vpop.xlane.xlu0 %1018 }
 0x273   : > { %v1020_v48 = vrot.slane %v1019_v40, 4 }
 0x275   : > { %v1021_v33 = vadd.f32 %v1020_v48, %v1019_v40 }
 0x276   : > { %v1149_v7 = vpop.xlane.xlu0 %1148 }
 0x277   : > { %v1022_v6 = vrot.slane %v1021_v33, 2  ;;  %v1150_v8 = vrot.slane %v1149_v7, 4 }
 0x279   : > { %v1151_v17 = vadd.f32 %v1150_v8, %v1149_v7  ;;  %v1023_v0 = vadd.f32 %v1022_v6, %v1021_v33 }
 0x27b   : > { %v1152_v26 = vrot.slane %v1151_v17, 2  ;;  %v1024_v5 = vrot.slane %v1023_v0, 1  ;;  %s1388_s11 = spop %1387 }
 0x27c   : > { %s687_s20 = smul.f32 0.025, %s1388_s11  ;;  %s2088_s11 = scalar_lea.hbm %s2136_s6, %s1339_s13 }
 0x27d   : > { %v1153_v54 = vadd.f32 %v1152_v26, %v1151_v17  ;;  %v1025_v47 = vadd.f32 %v1024_v5, %v1023_v0 }
 0x27e   : > { %v1160_v27 = vstv %s687_s20  ;;  %s1505_s20 = scalar_lea.vmem %s2090_s15, 128 }
 0x27f   : > { %1391 = vpush %v1025_v47  ;;  %v1154_v9 = vrot.slane %v1153_v54, 1  ;;  %v1161_v25 = vsel %vm748_vm7, %v1160_v27, 0.0  ;;  %p1506_p11 = scmp.ne.s32.totalorder %s2090_s15, %s1505_s20 }
 0x280   : > { %s1390_s18 = spop %1389 }
 0x281   : > { %v1155_v10 = vadd.f32 %v1154_v9, %v1153_v54  ;;  %s857_s28 = smul.f32 0.025, %s1390_s18  ;;  %s1172_s18 = scalar_lea.sflag [#allocation3], %s395_s19 }
 0x282   : > { %p1507_p12 = pnand %p1506_p11, %p1645_p5 }
 0x283   : > { %1393 = vpush %v1155_v10  ;;  %v1163_v56 = vstv %s857_s28 }
 0x284   : > { %v1164_v34 = vsel %vm918_vm8, %v1163_v56, 0.0  ;;  %p1508_p13 = pneg %p1507_p12 }
 0x2b0   : > { %s1392_s26 = spop %1391 }
 0x2b1   : > { %s1027_s9 = smul.f32 0.025, %s1392_s26  ;;  %s1509_s26 = sshll.u32 %s1571_s25, 4  ;;  %s1510_s26 = int_to_ptr.vmem [resolvable:$false] %s1509_s26 }
 0x2b2   : > { %s1511_s28 = scalar_lea.vmem %s1510_s26, 256  ;;  %p1512_p0 = scmp.lt.s32.totalorder %s2090_s15, %s1510_s26 }
 0x2b3   : > { %v1167_v3 = vstv %s1027_s9  ;;  %p1513_p1 = scmp.lt.s32.totalorder %s1511_s28, %s1505_s20 }
 0x2b4   : > { %s1394_s10 = spop %1393  ;;  %v1168_v4 = vsel %vm1166_vm14, %v1167_v3, 0.0 }
 0x2b5   : > { %s1157_s12 = smul.f32 0.025, %s1394_s10  ;;  %p1514_p2 = por %p1513_p1, %p1512_p0 }
 0x2b7   : > { %v1158_v42 = vstv %s1157_s12  ;;  %p1515_p3 = pnand %p1514_p2, %p1508_p13 }
 0x2b8   : > { %v1159_v31 = vsel %vm576_vm5, %v1158_v42, 0.0 }
 0x2b9   : > { %v1162_v11 = vadd.f32 %v1161_v25, %v1159_v31 }
 0x2bb   : > { %v1165_v12 = vadd.f32 %v1164_v34, %v1162_v11 }
 0x2bd   : > { %v1169_v13 = vadd.f32 %v1168_v4, %v1165_v12 }
 0x2bf   : > { %1170 = vst [vmem:[%s397_s14] sm:$0xff] %v1169_v13 }
 0x2c0   : > { %1518 = shalt.err (!%p1515_p3)
}
 0x2c1   : > { %s1519_s19 = scalar_lea.hbm %s2088_s11, 128  ;;  %s1523_s10 = scalar_lea.hbm %s2136_s6, 256 }
 0x2c2   : > { %p1520_p4 = scmp.ne.s32.totalorder %s2088_s11, %s1519_s19  ;;  %p1524_p9 = scmp.lt.u32.totalorder %s2088_s11, %s2136_s6 }
 0x2c3   : > { %p1525_p10 = scmp.lt.u32.totalorder %s1523_s10, %s1519_s19  ;;  %p1527_p12 = scmp.lt.u32.totalorder %s1519_s19, %s2088_s11 }
 0x2c4   : > { %p1521_p7 = pnand %p1520_p4, %p1645_p5 }
 0x2c5   : > { %p1526_p11 = por %p1525_p10, %p1524_p9 }
 0x2c6   : > { %p1522_p8 = pneg %p1521_p7 }
 0x2c7   : > { %p1528_p13 = por %p1527_p12, %p1526_p11 }
 0x2c9   : > { %p1529_p0 = pnand %p1528_p13, %p1522_p8 }
 0x2cb   : > { %1532 = shalt.err (!%p1529_p0)
}
 0x2cc   : > { %1395 = dma.vmem_to_hbm [thread:$0]  (%p1645_p5), %s2090_s15, 128, %s2088_s11, %s1172_s18  }
 0x2cd PF: > { %p1401_p1 = scmp.ge.s32.totalorder %s1567_s24, 2  ;;  %s1197_s14 = sand.u32 1, %s1555_s21  }
 0x2ce   : > { %s1198_s16 = scalar_lea.sflag [#allocation3], %s1197_s14 }
 0x2cf   : > { %p1398_p2 = pnand %p1401_p1, %p1649_p6 }
 0x2d1   : > { %1550 = dma.done.wait (!%p1398_p2), %s1198_s16, 128  }
 0x2d2   : > { %1552 = vsyncadd (!%p1398_p2), %s1198_s16, 4294967168  ;;  %p16_p3 = scmp.ge.s32.totalorder %s1632_s27, 4   ;;  %s2143_s21 = smov %s1559_s22 }
 0x2d3   : > { %s2144_s22 = smov %s1563_s23  ;;  %s2145_s23 = smov %s1643_s30 }
 0x2d4   : > { %s2146_s24 = smov %s1632_s27  ;;  %18 = sbr.rel (!%p16_p3) target bundleno = 3 (0x3), region = 94 }
 0x2db   :  { %1203 = vsyncpa [#allocation3], 1 }
 0x2dc   :  { %1205 = vsyncpa [#allocation3 + $0x1], 1 }

</bundles_post_ra>
